<compile_context>
chip_gen: v7x
topology: tpu7x:2x2x1
jax: 0.10.0
libtpu: 0.0.40
codegen_flags: <defaults>
</compile_context>

<pallas_src>
import functools
import math

import jax
import jax.numpy as jnp
from jax.experimental import pallas as pl
from jax.experimental.pallas import tpu as pltpu


# -----------------------------------------------------------------------------
# Pallas kernel: elementwise transform of one (TR, LANE_TILE) slab block.
# -----------------------------------------------------------------------------
def _transform_kernel(p_ref, o_ref, *, transform: str):
    # Compute in f32 (free on the VPU/EUP; kernel is HBM-bound), cast on store.
    x = p_ref[...].astype(jnp.float32)
    if transform == "softplus":
        # numerically stable softplus: log1p(exp(-|x|)) + max(x, 0)
        # NOTE: evaluated on padded edge elements too — fine, no reduction,
        # padded results are sliced away in the wrapper.
        y = jnp.log1p(jnp.exp(-jnp.abs(x))) + jnp.maximum(x, 0.0)
    elif transform == "exp":
        y = jnp.exp(x)
    elif transform == "sigmoid":
        y = jax.nn.sigmoid(x)
    else:
        raise ValueError(f"unknown transform: {transform}")
    o_ref[...] = y.astype(o_ref.dtype)


def _round_up(x: int, m: int) -> int:
    return (x + m - 1) // m * m


_LANE_TILE = 1024            # lane-dense slab width (multiple of 128)
_TARGET_BLOCK_BYTES = 2 << 20  # ~2 MiB per block; in+out double-buffered ~ 8 MiB


def _pallas_transform(param: jax.Array, transform: str) -> jax.Array:
    """Apply the named elementwise transform to `param` via a Pallas kernel."""
    if transform == "identity":
        # Pure pass-through: skip the kernel entirely (no HBM round trip).
        return param

    orig_shape = param.shape
    dtype = param.dtype
    itemsize = jnp.dtype(dtype).itemsize
    # Sublane packing: f32 -> 8, bf16 -> 16, int8 -> 32 rows per packed vreg.
    sub_align = 8 * max(1, 4 // itemsize)

    n = int(math.prod(orig_shape)) if orig_shape else 1
    flat = param.reshape(-1)

    # Pad the flat element count so it reshapes to (R, LANE_TILE) with R a
    # multiple of the sublane alignment (padding cost <= 32 KiB of elements).
    padded_n = _round_up(max(n, 1), sub_align * _LANE_TILE)
    if padded_n != n:
        flat = jnp.pad(flat, (0, padded_n - n))
    rows = padded_n // _LANE_TILE
    slab = flat.reshape(rows, _LANE_TILE)

    # Row-tile height: ~2 MiB blocks, sublane-pack aligned, capped at `rows`.
    tr = max(sub_align, _TARGET_BLOCK_BYTES // (_LANE_TILE * itemsize))
    tr = _round_up(tr, sub_align)
    tr = min(tr, rows)

    grid = (pl.cdiv(rows, tr),)
    kernel = functools.partial(_transform_kernel, transform=transform)

    out = pl.pallas_call(
        kernel,
        out_shape=jax.ShapeDtypeStruct((rows, _LANE_TILE), dtype),
        grid_spec=pltpu.PrefetchScalarGridSpec(
            num_scalar_prefetch=0,
            grid=grid,
            in_specs=[pl.BlockSpec((tr, _LANE_TILE), lambda i: (i, 0))],
            out_specs=pl.BlockSpec((tr, _LANE_TILE), lambda i: (i, 0)),
        ),
        compiler_params=pltpu.CompilerParams(
            dimension_semantics=("parallel",),   # megacore-shardable on v7x
            vmem_limit_bytes=32 << 20,           # well under v5e/v6e/v7x budgets
        ),
    )(slab)

    out_flat = out.reshape(-1)
    if padded_n != n:
        out_flat = out_flat[:n]
    return out_flat.reshape(orig_shape)


# -----------------------------------------------------------------------------
# Module-equivalent wrapper.
# -----------------------------------------------------------------------------
class TransformedParameter:
    """JAX/Pallas equivalent of gensn.parameters.TransformedParameter.

    `transform` names the elementwise transform compiled into the Pallas
    kernel ("identity" matches the PyTorch default transform_fn=None).
    """
    # TODO(synk): arbitrary Python transform_fn callables are not traced into
    # the kernel; only the named elementwise transforms above are supported.

    def __init__(self, tensor: jax.Array, transform: str | None = None):
        self.parameter = jnp.asarray(tensor)
        self.transform = "identity" if transform is None else transform

    @property
    def value(self):
        return self()

    def __call__(self, *args):
        # forward(*args): args are ignored, exactly like the PyTorch module.
        return _pallas_transform(self.parameter, self.transform)


# -----------------------------------------------------------------------------
# Demo / self-check.
# -----------------------------------------------------------------------------
if __name__ == "__main__":
    key = jax.random.PRNGKey(0)
    k1, k2 = jax.random.split(key)

    # Small parameter tensor (e.g. a learnable scale map): [32, 256] float32.
    param = jax.random.normal(k1, (32, 256), dtype=jnp.float32)

    # 1) Default: transform_fn=None -> identity (short-circuited, no kernel).
    mod_id = TransformedParameter(param)
    out_id = jax.block_until_ready(mod_id.value)
    assert out_id.shape == param.shape and out_id.dtype == param.dtype
    assert jnp.allclose(out_id, param), "identity transform mismatch"

    # 2) A non-trivial transform_fn (softplus), computed inside the kernel.
    mod_sp = TransformedParameter(param, transform="softplus")
    out_sp = jax.block_until_ready(mod_sp())
    ref_sp = jax.nn.softplus(param)
    assert out_sp.shape == param.shape and out_sp.dtype == param.dtype
    assert jnp.allclose(out_sp, ref_sp, atol=1e-6), "softplus transform mismatch"

    # 3) Ragged-shape bf16 parameter -> exercises padding + lane-dense slab
    #    path and the f32-compute / bf16-store path inside the kernel.
    param_bf = jax.random.normal(k2, (5, 37), dtype=jnp.float32).astype(jnp.bfloat16)
    mod_exp = TransformedParameter(param_bf, transform="exp")
    out_exp = jax.block_until_ready(mod_exp())
    ref_exp = jnp.exp(param_bf.astype(jnp.float32)).astype(jnp.bfloat16)
    assert out_exp.shape == param_bf.shape and out_exp.dtype == jnp.bfloat16
    assert jnp.allclose(out_exp.astype(jnp.float32),
                        ref_exp.astype(jnp.float32),
                        rtol=2e-2, atol=2e-2), "bf16 exp transform mismatch"

    print("KERNEL_OK")
</pallas_src>

<mosaic_0001>
module attributes {stable_mosaic.version = 11 : i64} {
  func.func @_transform_kernel(%arg0: i32, %arg1: memref<8x1024xf32, #tpu.memory_space<vmem>>, %arg2: memref<8x1024xf32, #tpu.memory_space<vmem>>) attributes {dimension_semantics = [#tpu.dimension_semantics<parallel>], iteration_bounds = array<i64: 1>, scalar_prefetch = 0 : i64, scratch_operands = 0 : i64, tpu.core_type = #tpu.core_type<tc>, window_params = [{transform_indices = @transform_0, window_bounds = array<i64: 8, 1024>}, {transform_indices = @transform_1, window_bounds = array<i64: 8, 1024>}]} {
    %c0 = arith.constant 0 : index
    %c0_0 = arith.constant 0 : index
    %0 = vector.load %arg1[%c0, %c0_0] : memref<8x1024xf32, #tpu.memory_space<vmem>>, vector<8x1024xf32>
    %1 = math.absf %0 : vector<8x1024xf32>
    %cst = arith.constant 0.000000e+00 : f32
    %2 = vector.broadcast %cst : f32 to vector<8x1024xf32>
    %3 = arith.subf %2, %1 : vector<8x1024xf32>
    %4 = math.exp %3 : vector<8x1024xf32>
    %5 = math.log1p %4 : vector<8x1024xf32>
    %cst_1 = arith.constant 0.000000e+00 : f32
    %6 = vector.broadcast %cst_1 : f32 to vector<8x1024xf32>
    %7 = arith.maximumf %0, %6 : vector<8x1024xf32>
    %8 = arith.addf %5, %7 : vector<8x1024xf32>
    %c0_2 = arith.constant 0 : index
    %c0_3 = arith.constant 0 : index
    %9 = vector.load %arg2[%c0_2, %c0_3] : memref<8x1024xf32, #tpu.memory_space<vmem>>, vector<8x1024xf32>
    tpu.vector_store %arg2[%c0_2, %c0_3], %8 {strides = array<i32>} : memref<8x1024xf32, #tpu.memory_space<vmem>>, vector<8x1024xf32>,
    return
  }
  func.func @transform_0(%arg0: i32) -> (i32, i32) {
    %c0_i32 = arith.constant 0 : i32
    %c0_i32_0 = arith.constant 0 : i32
    return %arg0, %c0_i32 : i32, i32
  }
  func.func @transform_1(%arg0: i32) -> (i32, i32) {
    %c0_i32 = arith.constant 0 : i32
    %c0_i32_0 = arith.constant 0 : i32
    return %arg0, %c0_i32 : i32, i32
  }
}

</mosaic_0001>

<bundles_post_ra>
// kernel: tpu_custom_call.1
= control target key start
LH: loop header
LB: loop body
LE: loop exit
PB: predicated region body
PF: predicated region fallthrough
CT: control target
= control target key end

     0   :  { %6 = vsyncpa [#allocation3], 0  ;;  %s388_s0 = inlined_call_operand.hbm [shape: f32[8,1024], index: 0, kind: input, shape index: {}]   ;;  %s389_s1 = inlined_call_operand.hbm [shape: f32[8,1024], index: 1, kind: output, shape index: {}]  }
   0x1   :  { %7 = vsyncpa [#allocation4], 0  ;;  %s254_s6 = smov [#allocation2]   ;;  %s206_s10 = scalar_lea.hbm %s388_s0, 1024 }
   0x2   :  { %s14_s7 = sshll.u32 %s254_s6, 4  ;;  %p207_p0 = scmp.ne.s32.totalorder %s388_s0, %s206_s10  ;;  %s15_s7 = int_to_ptr.vmem [resolvable:$true] %s14_s7 }
   0x3   :  { %p210_p1 = scmp.lt.u32.totalorder %s206_s10, %s388_s0 }
   0x5   :  { %p212_p2 = pnand %p210_p1, %p207_p0 }
   0x7   :  { %215 = shalt.err (!%p212_p2)
}
   0x8   :  { %s216_s15 = scalar_lea.vmem %s15_s7, 1024  ;;  %p221_p4 = scmp.lt.s32.totalorder %s15_s7, %s15_s7 }
   0x9   :  { %p217_p3 = scmp.ne.s32.totalorder %s15_s7, %s216_s15  ;;  %p222_p5 = scmp.lt.s32.totalorder %s216_s15, %s216_s15 }
   0xb   :  { %p223_p6 = por %p222_p5, %p221_p4 }
   0xd   :  { %p224_p7 = pnand %p223_p6, %p217_p3 }
   0xf   :  { %227 = shalt.err (!%p224_p7)
}
  0x10   :  { %17 = dma.hbm_to_vmem [thread:$0]  %s388_s0, 1024, %s15_s7, [#allocation3]  }
  0x11   :  { %250 = dma.done.wait [#allocation3], 1024  }
  0x12   :  { %251 = vsyncadd [#allocation3], 4294966272  ;;  %v278_v0 = vld [vmem:[#allocation2] sm:$0xff]  ;;  %v280_v1 = vld [vmem:[#allocation2 + $0x8] sm:$0xff]  ;;  %s255_s0 = smov [#allocation5]  }
  0x13   :  { %v282_v2 = vld [vmem:[#allocation2 + $0x10] sm:$0xff]  ;;  %v29_v3 = vand.u32 2147483647, %v278_v0  ;;  %v30_v4 = vand.u32 2147483647, %v280_v1  ;;  %v287_v6 = vld [vmem:[#allocation2 + $0x18] sm:$0xff] }
  0x14   :  { %v31_v5 = vand.u32 2147483647, %v282_v2  ;;  %v289_v7 = vld [vmem:[#allocation2 + $0x20] sm:$0xff]  ;;  %v291_v8 = vld [vmem:[#allocation2 + $0x28] sm:$0xff]  ;;  %v32_v11 = vand.u32 2147483647, %v287_v6 }
  0x15   :  { %v37_v9 = vsub.f32 0.0, %v29_v3  ;;  %v38_v10 = vsub.f32 0.0, %v30_v4  ;;  %v294_v12 = vld [vmem:[#allocation2 + $0x30] sm:$0xff]  ;;  %v33_v14 = vand.u32 2147483647, %v289_v7  ;;  %v299_v24 = vld [vmem:[#allocation2 + $0x38] sm:$0xff] }
  0x16   :  { %v39_v13 = vsub.f32 0.0, %v31_v5  ;;  %v34_v15 = vand.u32 2147483647, %v291_v8  ;;  %v40_v18 = vsub.f32 0.0, %v32_v11  ;;  %v35_v22 = vand.u32 2147483647, %v294_v12 }
  0x17   :  { %v45_v16 = vmul.f32 1.442695, %v37_v9  ;;  %v47_v17 = vmul.f32 1.442695, %v38_v10  ;;  %v41_v20 = vsub.f32 0.0, %v33_v14  ;;  %v133_v45 = vmax.f32 %v278_v0, 0.0 }
  0x18   :  { %v49_v19 = vmul.f32 1.442695, %v39_v13  ;;  %v42_v21 = vsub.f32 0.0, %v34_v15  ;;  %v51_v23 = vmul.f32 1.442695, %v40_v18  ;;  %v43_v26 = vsub.f32 0.0, %v35_v22 }
  0x19   :  { %174 = vpow2.f32 %v45_v16  ;;  %v53_v25 = vmul.f32 1.442695, %v41_v20  ;;  %v36_v28 = vand.u32 2147483647, %v299_v24  ;;  %v134_v53 = vmax.f32 %v280_v1, 0.0  ;;  %s163_s18 = sshll.u32 %s255_s0, 4  ;;  %s164_s18 = int_to_ptr.vmem [resolvable:$true] %s163_s18 }
  0x1a   :  { %176 = vpow2.f32 %v47_v17  ;;  %v55_v27 = vmul.f32 1.442695, %v42_v21  ;;  %v57_v29 = vmul.f32 1.442695, %v43_v26  ;;  %v135_v54 = vmax.f32 %v282_v2, 0.0  ;;  %s228_s19 = scalar_lea.vmem %s164_s18, 1024  ;;  %p233_p9 = scmp.lt.s32.totalorder %s164_s18, %s164_s18 }
  0x1b   :  { %178 = vpow2.f32 %v49_v19  ;;  %v44_v30 = vsub.f32 0.0, %v36_v28  ;;  %v136_v61 = vmax.f32 %v287_v6, 0.0  ;;  %p229_p8 = scmp.ne.s32.totalorder %s164_s18, %s228_s19  ;;  %p234_p10 = scmp.lt.s32.totalorder %s228_s19, %s228_s19 }
  0x1c   :  { %180 = vpow2.f32 %v51_v23 }
  0x1d   :  { %182 = vpow2.f32 %v53_v25  ;;  %v59_v31 = vmul.f32 1.442695, %v44_v30  ;;  %p235_p11 = por %p234_p10, %p233_p9 }
  0x1e   :  { %184 = vpow2.f32 %v55_v27 }
  0x1f   :  { %186 = vpow2.f32 %v57_v29  ;;  %p236_p12 = pnand %p235_p11, %p229_p8 }
  0x20   :  { %188 = vpow2.f32 %v59_v31 }
  0x23   :  { %v175_v32 = vpop.eup %174 }
  0x24   :  { %v177_v33 = vpop.eup %176  ;;  %v61_v34 = vadd.f32 1.0, %v175_v32  ;;  %v64_v40 = vmul.f32 -0.5, %v175_v32  ;;  %v67_v44 = vand.u32 2147483647, %v175_v32 }
  0x25   :  { %v179_v35 = vpop.eup %178  ;;  %v70_v36 = vadd.f32 1.0, %v177_v33  ;;  %v73_v41 = vmul.f32 -0.5, %v177_v33  ;;  %v76_v48 = vand.u32 2147483647, %v177_v33 }
  0x26   :  { %v181_v37 = vpop.eup %180  ;;  %190 = vlog2.f32 %v61_v34  ;;  %v79_v38 = vadd.f32 1.0, %v179_v35  ;;  %v82_v46 = vmul.f32 -0.5, %v179_v35  ;;  %v65_v51 = vadd.f32 1.0, %v64_v40 }
  0x27   :  { %v302_v39 = vpop.eup %182  ;;  %192 = vlog2.f32 %v70_v36  ;;  %v88_v42 = vadd.f32 1.0, %v181_v37  ;;  %v91_v49 = vmul.f32 -0.5, %v181_v37  ;;  %v74_v52 = vadd.f32 1.0, %v73_v41 }
  0x28   :  { %194 = vlog2.f32 %v79_v38  ;;  %v304_v43 = vpop.eup %184  ;;  %v97_v50 = vadd.f32 1.0, %v302_v39  ;;  %v85_v56 = vand.u32 2147483647, %v179_v35  ;;  %v100_v57 = vmul.f32 -0.5, %v302_v39 }
  0x29   :  { %v307_v47 = vpop.eup %186  ;;  %196 = vlog2.f32 %v88_v42  ;;  %v106_v58 = vadd.f32 1.0, %v304_v43  ;;  %v83_v59 = vadd.f32 1.0, %v82_v46  ;;  %v94_v60 = vand.u32 2147483647, %v181_v37 }
  0x2a   :  { %v312_v55 = vpop.eup %188  ;;  %198 = vlog2.f32 %v97_v50  ;;  %v115_v62 = vadd.f32 1.0, %v307_v47  ;;  %vm318_vm0 = vcmp.lt.f32.partialorder %v67_v44, 0.0004427343  ;;  %vm322_vm1 = vcmp.lt.f32.partialorder %v76_v48, 0.0004427343 }
  0x2b   :  { %v92_v1 = vadd.f32 1.0, %v91_v49  ;;  %200 = vlog2.f32 %v106_v58  ;;  %v66_v2 = vmul.f32 %v175_v32, %v65_v51  ;;  %v109_v3 = vmul.f32 -0.5, %v304_v43 }
  0x2c   :  { %202 = vlog2.f32 %v115_v62  ;;  %v124_v4 = vadd.f32 1.0, %v312_v55  ;;  %v75_v6 = vmul.f32 %v177_v33, %v74_v52  ;;  %vm328_vm2 = vcmp.lt.f32.partialorder %v85_v56, 0.0004427343 }
  0x2d   :  { %v101_v10 = vadd.f32 1.0, %v100_v57  ;;  %v118_v11 = vmul.f32 -0.5, %v307_v47  ;;  %v84_v15 = vmul.f32 %v179_v35, %v83_v59  ;;  %vm333_vm3 = vcmp.lt.f32.partialorder %v94_v60, 0.0004427343 }
  0x2e   :  { %204 = vlog2.f32 %v124_v4  ;;  %v93_v19 = vmul.f32 %v181_v37, %v92_v1  ;;  %v103_v20 = vand.u32 2147483647, %v302_v39  ;;  %v127_v21 = vmul.f32 -0.5, %v312_v55 }
  0x2f   :  { %v110_v25 = vadd.f32 1.0, %v109_v3  ;;  %v112_v26 = vand.u32 2147483647, %v304_v43  ;;  %v102_v30 = vmul.f32 %v302_v39, %v101_v10  ;;  %v119_v31 = vadd.f32 1.0, %v118_v11 }
  0x30   :  { %v191_v5 = vpop.eup %190  ;;  %v121_v35 = vand.u32 2147483647, %v307_v47  ;;  %vm348_vm4 = vcmp.lt.f32.partialorder %v103_v20, 0.0004427343  ;;  %v137_v40 = vmax.f32 %v289_v7, 0.0  ;;  %v128_v41 = vadd.f32 1.0, %v127_v21 }
  0x31   :  { %v193_v13 = vpop.eup %192  ;;  %v63_v14 = vmul.f32 0.6931472, %v191_v5  ;;  %v111_v44 = vmul.f32 %v304_v43, %v110_v25  ;;  %vm357_vm5 = vcmp.lt.f32.partialorder %v112_v26, 0.0004427343  ;;  %v138_v50 = vmax.f32 %v291_v8, 0.0 }
  0x32   :  { %v195_v17 = vpop.eup %194  ;;  %v72_v18 = vmul.f32 0.6931472, %v193_v13  ;;  %v120_v7 = vmul.f32 %v307_v47, %v119_v31  ;;  %vm365_vm6 = vcmp.lt.f32.partialorder %v121_v35, 0.0004427343  ;;  %v129_v58 = vmul.f32 %v312_v55, %v128_v41 }
  0x33   :  { %v69_v22 = vsel %vm318_vm0, %v66_v2, %v63_v14  ;;  %v81_v23 = vmul.f32 0.6931472, %v195_v17  ;;  %v197_v27 = vpop.eup %196  ;;  %v140_v47 = vmax.f32 %v299_v24, 0.0 }
  0x34   :  { %v141_v28 = vadd.f32 %v133_v45, %v69_v22  ;;  %v78_v29 = vsel %vm322_vm1, %v75_v6, %v72_v18  ;;  %v90_v34 = vmul.f32 0.6931472, %v197_v27  ;;  %v199_v36 = vpop.eup %198  ;;  %v130_v45 = vand.u32 2147483647, %v312_v55 }
  0x35   :  { %v142_v32 = vadd.f32 %v134_v53, %v78_v29  ;;  %v87_v33 = vsel %vm328_vm2, %v84_v15, %v81_v23  ;;  %v99_v42 = vmul.f32 0.6931472, %v199_v36  ;;  %v201_v46 = vpop.eup %200 }
  0x36   :  { %149 = vst [vmem:[#allocation5] sm:$0xff] %v141_v28  ;;  %v143_v37 = vadd.f32 %v135_v54, %v87_v33  ;;  %v96_v39 = vsel %vm333_vm3, %v93_v19, %v90_v34  ;;  %v203_v51 = vpop.eup %202  ;;  %v108_v53 = vmul.f32 0.6931472, %v201_v46  ;;  %v139_v54 = vmax.f32 %v294_v12, 0.0 }
  0x37   :  { %150 = vst [vmem:[#allocation5 + $0x8] sm:$0xff] %v142_v32  ;;  %v144_v48 = vadd.f32 %v136_v61, %v96_v39  ;;  %v105_v52 = vsel %vm348_vm4, %v102_v30, %v99_v42  ;;  %v117_v57 = vmul.f32 0.6931472, %v203_v51  ;;  %vm131_vm7 = vcmp.lt.f32.partialorder %v130_v45, 0.0004427343 }
  0x38   :  { %151 = vst [vmem:[#allocation5 + $0x10] sm:$0xff] %v143_v37  ;;  %v145_v56 = vadd.f32 %v137_v40, %v105_v52  ;;  %v205_v59 = vpop.eup %204  ;;  %v114_v8 = vsel %vm357_vm5, %v111_v44, %v108_v53 }
  0x39   :  { %152 = vst [vmem:[#allocation5 + $0x18] sm:$0xff] %v144_v48  ;;  %v146_v60 = vadd.f32 %v138_v50, %v114_v8  ;;  %v123_v61 = vsel %vm365_vm6, %v120_v7, %v117_v57  ;;  %v126_v62 = vmul.f32 0.6931472, %v205_v59 }
  0x3a   :  { %153 = vst [vmem:[#allocation5 + $0x20] sm:$0xff] %v145_v56  ;;  %v147_v12 = vadd.f32 %v139_v54, %v123_v61 }
  0x3b   :  { %154 = vst [vmem:[#allocation5 + $0x28] sm:$0xff] %v146_v60  ;;  %v132_v63 = vsel %vm131_vm7, %v129_v58, %v126_v62 }
  0x3c   :  { %155 = vst [vmem:[#allocation5 + $0x30] sm:$0xff] %v147_v12  ;;  %v148_v55 = vadd.f32 %v140_v47, %v132_v63 }
  0x3e   :  { %156 = vst [vmem:[#allocation5 + $0x38] sm:$0xff] %v148_v55 }
  0x3f   :  { %239 = shalt.err (!%p236_p12)
}
  0x40   :  { %s240_s22 = scalar_lea.hbm %s389_s1, 1024 }
  0x41   :  { %p241_p13 = scmp.ne.s32.totalorder %s389_s1, %s240_s22  ;;  %p244_p0 = scmp.lt.u32.totalorder %s240_s22, %s389_s1 }
  0x43   :  { %p246_p1 = pnand %p244_p0, %p241_p13 }
  0x45   :  { %249 = shalt.err (!%p246_p1)
}
  0x46   :  { %166 = dma.vmem_to_hbm [thread:$0]  %s164_s18, 1024, %s389_s1, [#allocation4]  }
  0x47   :  { %252 = dma.done.wait [#allocation4], 1024  }
  0x48   :  { %253 = vsyncadd [#allocation4], 4294966272 }
  0x49   :  { %170 = vsyncpa [#allocation3], 1 }
  0x4a   :  { %171 = vsyncpa [#allocation4], 1 }

</bundles_post_ra>
